<compile_context>
chip_gen: v7x
topology: tpu7x:2x2x1
jax: 0.10.0
libtpu: 0.0.40
codegen_flags: <defaults>
</compile_context>

<pallas_src>
import functools

import jax
import jax.numpy as jnp
import numpy as np
from jax.experimental import pallas as pl
from jax.experimental.pallas import tpu as pltpu

_TARGET_BLOCK_BYTES = 4 * 2**20     # per-step DMA sweet spot (~1-8 MiB)


def _vmem_capacity_bytes():
    try:
        return int(pltpu.get_tpu_info().vmem_capacity_bytes)
    except Exception:
        return 64 * 2**20           # conservative default (v7x per-core VMEM)


# --------------------------- path A: fully fused -----------------------------

def _eca_fused_kernel(w_ref, x_ref, o_ref, *, k_size):
    # w_ref: (k,) f32 in SMEM.  x_ref / o_ref: (Bt, C, HW) blocks in VMEM.
    xb = x_ref[...]                                         # input dtype
    Bt, C, HW = xb.shape
    pad = (k_size - 1) // 2

    # Global average pool: lane-axis reduce, accumulated in f32 only.
    m = jnp.sum(xb, axis=2, keepdims=True, dtype=jnp.float32) * (1.0 / HW)  # (Bt,C,1)

    # Conv1d(1,1,k, zero pad) across channels on the tiny (Bt, C, 1) vector.
    if pad > 0:
        zpad = jnp.zeros((Bt, pad, 1), jnp.float32)
        mp = jnp.concatenate([zpad, m, zpad], axis=1)       # (Bt, C+2*pad, 1)
    else:
        mp = m
    conv = jnp.zeros((Bt, C, 1), jnp.float32)
    for j in range(k_size):                                 # unrolled k taps
        conv = conv + w_ref[j] * mp[:, j:j + C, :]

    y = jax.nn.sigmoid(conv)                                # (Bt, C, 1)

    # Gate in the input dtype (no full-block f32 temp); broadcasts over lanes.
    o_ref[...] = (xb * y.astype(xb.dtype)).astype(o_ref.dtype)


def _eca_fused(x_flat, w, k_size, vmem_cap):
    N, C, HW = x_flat.shape
    img_bytes = C * HW * x_flat.dtype.itemsize

    # Pack several small images per step (block near the DMA sweet spot) while
    # keeping >= 2 grid steps when N >= 2 (v7x has 2 TensorCores).
    bt = 1
    for d in range(1, N + 1):
        if (N % d == 0 and d * img_bytes <= _TARGET_BLOCK_BYTES
                and (N // d >= 2 or N == 1)):
            bt = d
    block_bytes = bt * img_bytes

    vmem_limit = int(min(int(0.75 * vmem_cap),
                         max(32 * 2**20, 5 * block_bytes + (2 << 20))))

    cost = pl.CostEstimate(
        flops=int(2 * N * C * HW + 2 * N * C * k_size),      # mean + gate + conv
        transcendentals=int(N * C),                          # sigmoid
        bytes_accessed=int(2 * N * C * HW * x_flat.dtype.itemsize + 4 * k_size),
    )

    return pl.pallas_call(
        functools.partial(_eca_fused_kernel, k_size=k_size),
        out_shape=jax.ShapeDtypeStruct((N, C, HW), x_flat.dtype),
        grid=(N // bt,),
        in_specs=[
            pl.BlockSpec(memory_space=pltpu.MemorySpace.SMEM),   # conv taps
            pl.BlockSpec((bt, C, HW), lambda b: (b, 0, 0)),
        ],
        out_specs=pl.BlockSpec((bt, C, HW), lambda b: (b, 0, 0)),
        compiler_params=pltpu.CompilerParams(
            dimension_semantics=("parallel",),
            vmem_limit_bytes=vmem_limit,
        ),
        cost_estimate=cost,
    )(w, x_flat)


# --------------- path B: two-phase fallback for very large images ------------

def _eca_weights_kernel(w_ref, x_ref, y_ref, acc_ref, *, k_size, hw_total, hw_t):
    # Accumulates the channel sum over HW chunks, then conv + sigmoid at the end.
    h = pl.program_id(1)

    @pl.when(h == 0)
    def _():
        acc_ref[...] = jnp.zeros_like(acc_ref)

    xb = x_ref[...]                                         # (1, C, hw_t)
    lane = jax.lax.broadcasted_iota(jnp.int32, xb.shape, 2)
    valid = (h * hw_t + lane) < hw_total                    # mask padded tail
    xm = jnp.where(valid, xb, jnp.zeros_like(xb))
    acc_ref[...] += jnp.sum(xm, axis=2, keepdims=True, dtype=jnp.float32)

    @pl.when(h == pl.num_programs(1) - 1)
    def _():
        C = acc_ref.shape[1]
        pad = (k_size - 1) // 2
        m = acc_ref[...] * (1.0 / hw_total)                 # (1, C, 1)
        if pad > 0:
            zpad = jnp.zeros((1, pad, 1), jnp.float32)
            mp = jnp.concatenate([zpad, m, zpad], axis=1)
        else:
            mp = m
        conv = jnp.zeros((1, C, 1), jnp.float32)
        for j in range(k_size):
            conv = conv + w_ref[j] * mp[:, j:j + C, :]
        y_ref[...] = jax.nn.sigmoid(conv)


def _eca_gate_kernel(y_ref, x_ref, o_ref):
    xb = x_ref[...]
    o_ref[...] = (xb * y_ref[...].astype(xb.dtype)).astype(o_ref.dtype)


def _eca_two_phase(x_flat, w, k_size, vmem_cap):
    N, C, HW = x_flat.shape
    itemsize = x_flat.dtype.itemsize

    # HW chunk: multiple of 128 lanes, ~2 MiB per block.
    hw_t = max(128, ((2 * 2**20) // max(1, C * itemsize)) // 128 * 128)
    if hw_t >= HW:
        hw_t = HW
    n_hw = pl.cdiv(HW, hw_t)
    chunk_bytes = C * hw_t * itemsize
    vmem_limit = int(min(int(0.75 * vmem_cap),
                         max(32 * 2**20, 5 * chunk_bytes + (4 << 20))))

    # Phase 1: per-image channel attention weights y: (N, C, 1) f32.
    y = pl.pallas_call(
        functools.partial(_eca_weights_kernel, k_size=k_size,
                          hw_total=HW, hw_t=hw_t),
        out_shape=jax.ShapeDtypeStruct((N, C, 1), jnp.float32),
        grid=(N, n_hw),
        in_specs=[
            pl.BlockSpec(memory_space=pltpu.MemorySpace.SMEM),
            pl.BlockSpec((1, C, hw_t), lambda b, h: (b, 0, h)),
        ],
        out_specs=pl.BlockSpec((1, C, 1), lambda b, h: (b, 0, 0)),
        scratch_shapes=[pltpu.VMEM((1, C, 1), jnp.float32)],
        compiler_params=pltpu.CompilerParams(
            dimension_semantics=("parallel", "arbitrary"),
            vmem_limit_bytes=vmem_limit,
        ),
    )(w, x_flat)

    # Phase 2: gate (memory-bound, both axes parallel).
    return pl.pallas_call(
        _eca_gate_kernel,
        out_shape=jax.ShapeDtypeStruct((N, C, HW), x_flat.dtype),
        grid=(N, n_hw),
        in_specs=[
            pl.BlockSpec((1, C, 1), lambda b, h: (b, 0, 0)),
            pl.BlockSpec((1, C, hw_t), lambda b, h: (b, 0, h)),
        ],
        out_specs=pl.BlockSpec((1, C, hw_t), lambda b, h: (b, 0, h)),
        compiler_params=pltpu.CompilerParams(
            dimension_semantics=("parallel", "parallel"),
            vmem_limit_bytes=vmem_limit,
        ),
    )(y, x_flat)


# ---------------------------------- wrapper ----------------------------------

@functools.partial(jax.jit, static_argnames=("k_size",))
def eca_pallas(x_nchw, w, k_size=3):
    """ECA forward.  x_nchw: (N, C, H, W); w: (k,) Conv1d taps."""
    N, C, H, W = x_nchw.shape
    HW = H * W
    x_flat = x_nchw.reshape(N, C, HW)          # H*W on the 128-lane axis
    w = w.reshape(-1).astype(jnp.float32)

    vmem_cap = _vmem_capacity_bytes()
    img_bytes = C * HW * x_flat.dtype.itemsize
    # Single-pass (fused) only if a whole image (double-buffered in+out) fits
    # comfortably in this generation's VMEM; otherwise two-phase split.
    if 5 * img_bytes + (2 << 20) <= int(0.7 * vmem_cap):
        out = _eca_fused(x_flat, w, k_size, vmem_cap)
    else:
        out = _eca_two_phase(x_flat, w, k_size, vmem_cap)
    return out.reshape(N, C, H, W)


# ------------------------------ pure-JAX reference ---------------------------

def reference_jax(x, w, k_size=3):
    N, C, H, W = x.shape
    pad = (k_size - 1) // 2
    m = x.astype(jnp.float32).mean(axis=(2, 3))              # (N, C)
    mp = jnp.pad(m, ((0, 0), (pad, pad)))
    conv = jnp.zeros_like(m)
    for j in range(k_size):
        conv = conv + w[j] * mp[:, j:j + C]
    y = jax.nn.sigmoid(conv)                                 # (N, C)
    return (x * y[:, :, None, None]).astype(x.dtype)


# ------------------------------------ main -----------------------------------

if __name__ == "__main__":
    N, C, H, W = 2, 4, 16, 16
    K_SIZE = 3
    key = jax.random.PRNGKey(0)
    kx, kw = jax.random.split(key)
    x = jax.random.normal(kx, (N, C, H, W), jnp.float32)     # NCHW, like PyTorch
    w = 0.5 * jax.random.normal(kw, (K_SIZE,), jnp.float32)  # Conv1d(1,1,3) taps

    ref = jax.block_until_ready(reference_jax(x, w, K_SIZE))
    out = jax.block_until_ready(eca_pallas(x, w, k_size=K_SIZE))

    np.testing.assert_allclose(np.asarray(out), np.asarray(ref),
                               rtol=1e-5, atol=1e-5)
    print("KERNEL_OK")
</pallas_src>

<mosaic_0001>
module attributes {stable_mosaic.version = 11 : i64} {
  func.func @_eca_fused_kernel(%arg0: i32, %arg1: memref<3xf32, #tpu.memory_space<smem>>, %arg2: memref<1x4x256xf32, #tpu.memory_space<vmem>>, %arg3: memref<1x4x256xf32, #tpu.memory_space<vmem>>) attributes {dimension_semantics = [#tpu.dimension_semantics<parallel>], iteration_bounds = array<i64: 2>, scalar_prefetch = 0 : i64, scratch_operands = 0 : i64, tpu.core_type = #tpu.core_type<tc>, window_params = [{transform_indices = @transform_0, window_bounds = array<i64: 3>}, {transform_indices = @transform_1, window_bounds = array<i64: 1, 4, 256>}, {transform_indices = @transform_2, window_bounds = array<i64: 1, 4, 256>}]} {
    %c0 = arith.constant 0 : index
    %c0_0 = arith.constant 0 : index
    %c0_1 = arith.constant 0 : index
    %0 = vector.load %arg2[%c0, %c0_0, %c0_1] : memref<1x4x256xf32, #tpu.memory_space<vmem>>, vector<1x4x256xf32>
    %cst = arith.constant dense<0.000000e+00> : vector<1x4xf32>
    %1 = vector.multi_reduction <add>, %0, %cst [2] : vector<1x4x256xf32> to vector<1x4xf32>
    %2 = vector.shape_cast %1 : vector<1x4xf32> to vector<1x4x1xf32>
    %cst_2 = arith.constant 3.906250e-03 : f32
    %3 = vector.broadcast %cst_2 : f32 to vector<1x4x1xf32>
    %4 = arith.mulf %2, %3 : vector<1x4x1xf32>
    %cst_3 = arith.constant 0.000000e+00 : f32
    %5 = vector.broadcast %cst_3 : f32 to vector<1x1x1xf32>
    %6 = tpu.concatenate %5, %4, %5 in 1 : vector<1x1x1xf32>, vector<1x4x1xf32>, vector<1x1x1xf32> -> vector<1x6x1xf32>
    %cst_4 = arith.constant 0.000000e+00 : f32
    %7 = vector.broadcast %cst_4 : f32 to vector<1x4x1xf32>
    %c0_5 = arith.constant 0 : index
    %8 = memref.load %arg1[%c0_5] : memref<3xf32, #tpu.memory_space<smem>>
    %9 = vector.extract_strided_slice %6 {offsets = [0, 0, 0], sizes = [1, 4, 1], strides = [1, 1, 1]} : vector<1x6x1xf32> to vector<1x4x1xf32>
    %10 = vector.broadcast %8 : f32 to vector<1x4x1xf32>
    %11 = arith.mulf %10, %9 : vector<1x4x1xf32>
    %12 = arith.addf %7, %11 : vector<1x4x1xf32>
    %c1 = arith.constant 1 : index
    %13 = memref.load %arg1[%c1] : memref<3xf32, #tpu.memory_space<smem>>
    %14 = vector.extract_strided_slice %6 {offsets = [0, 1, 0], sizes = [1, 4, 1], strides = [1, 1, 1]} : vector<1x6x1xf32> to vector<1x4x1xf32>
    %15 = vector.broadcast %13 : f32 to vector<1x4x1xf32>
    %16 = arith.mulf %15, %14 : vector<1x4x1xf32>
    %17 = arith.addf %12, %16 : vector<1x4x1xf32>
    %c2 = arith.constant 2 : index
    %18 = memref.load %arg1[%c2] : memref<3xf32, #tpu.memory_space<smem>>
    %19 = vector.extract_strided_slice %6 {offsets = [0, 2, 0], sizes = [1, 4, 1], strides = [1, 1, 1]} : vector<1x6x1xf32> to vector<1x4x1xf32>
    %20 = vector.broadcast %18 : f32 to vector<1x4x1xf32>
    %21 = arith.mulf %20, %19 : vector<1x4x1xf32>
    %22 = arith.addf %17, %21 : vector<1x4x1xf32>
    %23 = arith.negf %22 : vector<1x4x1xf32>
    %24 = math.exp %23 : vector<1x4x1xf32>
    %cst_6 = arith.constant 1.000000e+00 : f32
    %25 = vector.broadcast %cst_6 : f32 to vector<1x4x1xf32>
    %26 = arith.addf %25, %24 : vector<1x4x1xf32>
    %27 = arith.divf %25, %26 : vector<1x4x1xf32>
    %28 = vector.broadcast %27 : vector<1x4x1xf32> to vector<1x4x256xf32>
    %29 = arith.mulf %0, %28 : vector<1x4x256xf32>
    %c0_7 = arith.constant 0 : index
    %c0_8 = arith.constant 0 : index
    %c0_9 = arith.constant 0 : index
    %30 = vector.load %arg3[%c0_7, %c0_8, %c0_9] : memref<1x4x256xf32, #tpu.memory_space<vmem>>, vector<1x4x256xf32>
    tpu.vector_store %arg3[%c0_7, %c0_8, %c0_9], %29 {strides = array<i32>} : memref<1x4x256xf32, #tpu.memory_space<vmem>>, vector<1x4x256xf32>,
    return
  }
  func.func @transform_0(%arg0: i32) -> i32 {
    %c0_i32 = arith.constant 0 : i32
    %c0_i32_0 = arith.constant 0 : i32
    return %c0_i32 : i32
  }
  func.func @transform_1(%arg0: i32) -> (i32, i32, i32) {
    %c0_i32 = arith.constant 0 : i32
    %c0_i32_0 = arith.constant 0 : i32
    %c0_i32_1 = arith.constant 0 : i32
    return %arg0, %c0_i32, %c0_i32_0 : i32, i32, i32
  }
  func.func @transform_2(%arg0: i32) -> (i32, i32, i32) {
    %c0_i32 = arith.constant 0 : i32
    %c0_i32_0 = arith.constant 0 : i32
    %c0_i32_1 = arith.constant 0 : i32
    return %arg0, %c0_i32, %c0_i32_0 : i32, i32, i32
  }
}

</mosaic_0001>

<bundles_post_ra>
// kernel: eca_pallas.1
= control target key start
LH: loop header
LB: loop body
LE: loop exit
PB: predicated region body
PF: predicated region fallthrough
CT: control target
= control target key end

     0   :  { %7 = vsyncpa [#allocation3], 0  ;;  %s371_s9 = smov 0   ;;  %s409_s0 = inlined_call_operand.vmem [shape: f32[3], index: 0, kind: input, shape index: {}]   ;;  %s410_s1 = inlined_call_operand.vmem [shape: f32[2,4,256], index: 1, kind: input, shape index: {}]   ;;  %s411_s2 = inlined_call_operand.vmem [shape: f32[2,4,256], index: 2, kind: output, shape index: {}]  }
   0x1 LB: > { %s281_s10 = sadd.s32 4294967295, %s351_s9   ;;  %p283_p0 = scmp.ge.s32.totalorder %s351_s9, 1  ;;  %s351_s9 = sphi %s371_s9, %s13_s9  }
   0x2   : > { %p91_p1 = scmp.lt.s32.totalorder %s351_s9, 3  ;;  %s104_s13 = sshll.u32 %s409_s0, 4  ;;  %s105_s13 = int_to_ptr.vmem [resolvable:$true] %s104_s13 }
   0x3   : > { %p307_p3 = scmp.eq.s32.totalorder %s281_s10, 0  ;;  %s326_s15 = scalar_lea.vmem %s105_s13, 16 }
   0x4   : > { %p382_p2 = pnand %p283_p0, %p91_p1  ;;  %p327_p6 = scmp.ne.s32.totalorder %s105_s13, %s326_s15 }
   0x5   : > { %p334_p10 = scmp.lt.s32.totalorder %s105_s13, %s105_s13  ;;  %p335_p11 = scmp.lt.s32.totalorder %s326_s15, %s326_s15 }
   0x6   : > { %p303_p4 = pneg %p382_p2 }
   0x7   : > { %p336_p12 = por %p335_p11, %p334_p10 }
   0x8   : > { %p304_p5 = pnand %p307_p3, %p303_p4 }
   0xa   : > { %p328_p7 = pneg %p304_p5 }
   0xc   : > { %p329_p8 = pnand %p328_p7, %p327_p6 }
   0xe   : > { %p330_p9 = pneg %p329_p8 }
  0x10   : > { %p337_p13 = pnand %p336_p12, %p330_p9 }
  0x12   : > { %340 = shalt.err (!%p337_p13)
}
  0x13   : > { %s353_s16 = smov [#allocation2]   ;;  %125 = sbr.rel (%p382_p2) target bundleno = 355 (0x163), region = 28 }
  0x14   : > { %306 = dma.vmem_to_smem (!%p304_p5), %s105_s13, 16, %s353_s16, [#allocation3]  }
  0x1a   : > { %346 = dma.done.wait (%p307_p3), [#allocation3], 16  }
  0x1b   : > { %348 = vsyncadd (%p307_p3), [#allocation3], 4294967280 }
  0x1c   : > { %131 = sfence }
  0x1d   : > { %p148_p0 = scmp.lt.s32.totalorder %s281_s10, 1  ;;  %vm162_vm0 = vcmask 1043456   ;;  %v354_v5 = vmov 0   ;;  %s292_s21 = sld [smem:[#allocation2 + $0x1]]  ;;  %vm172_vm1 = vcmask 1040384   ;;  %vm174_vm2 = vcmask 1044480  }
  0x1e   : > { %320 = vset.pattern.permute.xlu0 %v354_v5  ;;  %s293_s22 = sld [smem:[#allocation2 + $0x2]]  ;;  %s176_s23 = sld [smem:[#allocation2]]  ;;  %v355_v25 = vmov 839922192   ;;  %v207_v27 = vlaneseq }
  0x1f   : > { %s414_s10 = smov (!%p148_p0, %s281_s10), 1  ;;  %v205_v26 = vunpack.c.l.s4 %v355_v25 }
  0x20   : > { %s297_s17 = sshll.u32 %s414_s10, 3  ;;  %v208_v29 = vshrl.u32 %v207_v27, 7 }
  0x21   : > { %s152_s20 = scalar_lea.vmem %s410_s1, %s297_s17  ;;  %v206_v28 = vunpack.c.0.s8 %v205_v26  ;;  %s157_s26 = scalar_lea.vmem %s411_s2, %s297_s17 }
  0x22   : > { %v158_v0 = vld [vmem:[%s152_s20] sm:$0xff] }
  0x23   : > { %v160_v1 = vcombine.high %v158_v0, %v158_v0  ;;  %v163_v2 = vsel %vm162_vm0, %v158_v0, 0.0  ;;  %v181_v9 = vstv %s292_s21  ;;  %v209_v30 = vsub.s32 %v206_v28, %v208_v29 }
  0x24   : > { %v188_v10 = vstv %s293_s22  ;;  %v177_v12 = vstv %s176_s23 }
  0x25   : > { %v164_v3 = vsel %vm162_vm0, %v160_v1, 0.0 }
  0x26   : > { %v165_v4 = vadd.f32 %v164_v3, %v163_v2 }
  0x28   : > { %166 = vadd.xlane.f32.xlu0 %v165_v4 }
  0xb5   : > { %v167_v6 = vpop.xlane.xlu0 %166 }
  0xb6   : > { %v168_v7 = vmul.f32 0.00390625, %v167_v6 }
  0xb8   : > { %v170_v8 = vrot.slane %v168_v7, 7 }
  0xba   : > { %v173_v11 = vsel %vm172_vm1, 0.0, %v170_v8 }
  0xbb   : > { %v175_v13 = vsel %vm174_vm2, %v173_v11, 0.0 }
  0xbc   : > { %v182_v14 = vmul.f32 %v181_v9, %v175_v13  ;;  %v189_v15 = vmul.f32 %v188_v10, %v175_v13  ;;  %v178_v16 = vmul.f32 %v177_v12, %v175_v13 }
  0xbe   : > { %v184_v17 = vrot.slane %v182_v14, 1  ;;  %v191_v19 = vrot.slane %v189_v15, 2 }
  0xc0   : > { %v186_v18 = vadd.f32 %v184_v17, %v178_v16 }
  0xc2   : > { %v193_v20 = vadd.f32 %v191_v19, %v186_v18 }
  0xc4   : > { %v294_v21 = vmul.f32 -1.442695, %v193_v20 }
  0xc6   : > { %322 = vpow2.f32 %v294_v21 }
  0xd0   : > { %v323_v22 = vpop.eup %322 }
  0xd1   : > { %v197_v23 = vadd.f32 1.0, %v323_v22 }
  0xd3   : > { %324 = vrcp.f32 %v197_v23 }
  0xdd   : > { %v325_v24 = vpop.eup %324 }
  0xde   : > { %202 = vperm.xlu0 %320, %v325_v24  }
 0x15d   : > { %v203_v31 = vpop.permute.xlu0 %202 }
 0x15e   : > { %v210_v32 = vrot.slane %v203_v31, %v209_v30 }
 0x160   : > { %v212_v33 = vmul.f32 %v210_v32, %v158_v0 }
 0x162   : > { %213 = vst [vmem:[%s157_s26] sm:$0xff] %v212_v33 }
 0x163 PF: > { %s13_s9 = sadd.s32 1, %s351_s9  }
 0x164   : > { %p10_p1 = scmp.ge.s32.totalorder %s13_s9, 4  }
 0x166   :  { %12 = sbr.rel (!%p10_p1) target bundleno = 1 (0x1), region = 63 }
 0x16d   :  { %235 = vsyncpa [#allocation3], 1 }
 0x16e   :  { %237 = vsyncpa [#allocation3 + $0x1], 1 }

</bundles_post_ra>
